<compile_context>
chip_gen: v6e
topology: v6e:2x2x1
jax: 0.10.0
libtpu: 0.0.40
codegen_flags: <defaults>
</compile_context>

<pallas_src>
import functools

import jax
import jax.numpy as jnp
from jax import lax
from jax.experimental import pallas as pl
from jax.experimental.pallas import tpu as pltpu


LANE = 128      # TPU lane width: hidden/feature axes are padded to this
SUBLANE = 8     # f32 sublane: row counts are padded to this


def _round_up(x, m):
    return ((x + m - 1) // m) * m


def _pick_row_tile(n_rows, max_tile=256):
    """Largest multiple of 8 that divides n_rows and is <= max_tile."""
    t = min(max_tile, n_rows)
    t -= t % SUBLANE
    t = max(t, SUBLANE)
    while n_rows % t:
        t -= SUBLANE
    return t


# ----------------------------------------------------------------------------
# Pallas kernels
# ----------------------------------------------------------------------------
def _gru_update_kernel(mask_ref, m_ref, h_ref,
                       w_rzh_ref, u_rz_ref, u_h_ref, b_rzh_ref,
                       out_ref):
    """joint_GRUBayes update on one (TILE_N, Hp) row tile (dense + mask select)."""
    hp = h_ref.shape[-1]
    h = h_ref[...]                       # (tile_n, Hp) f32
    m = m_ref[...]                       # (tile_n, Dp) f32
    wd = w_rzh_ref.dtype                 # f32 (or bf16 weights on v6e/v7x)

    # Fused gate matmuls: one (tile_n, 3Hp) dot and one (tile_n, 2Hp) dot.
    g = jnp.dot(m.astype(wd), w_rzh_ref[...],
                preferred_element_type=jnp.float32) + b_rzh_ref[...]
    hu = jnp.dot(h.astype(wd), u_rz_ref[...],
                 preferred_element_type=jnp.float32)

    r = jax.nn.sigmoid(g[:, :hp] + hu[:, :hp])
    z = jax.nn.sigmoid(g[:, hp:2 * hp] + hu[:, hp:])
    h_tilde = jnp.tanh(
        g[:, 2 * hp:] + jnp.dot((h * r).astype(wd), u_h_ref[...],
                                preferred_element_type=jnp.float32))
    h_new = h_tilde + z * (h - h_tilde)

    # Per-row select: observed rows take the GRU update, others pass through.
    obs = mask_ref[...] > 0.5            # (tile_n, 1), broadcast over lanes
    out_ref[...] = jnp.where(obs, h_new, h)


def _gruode_kernel(dt_ref, h_ref, u_rz_ref, u_h_ref, b_rz_ref, b_h_ref,
                   out_ref, *, n_steps):
    """n_steps fused explicit-Euler steps of joint_GRUODE on a row tile."""
    hp = h_ref.shape[-1]
    tile_n = h_ref.shape[0]
    wd = u_rz_ref.dtype

    dt = dt_ref[0, 0]
    u_rz = u_rz_ref[...]
    u_h = u_h_ref[...]
    # Hoist the (1, X) -> (tile_n, X) bias broadcasts out of the step loop.
    b_rz = jnp.broadcast_to(b_rz_ref[...], (tile_n, 2 * hp))
    b_h = jnp.broadcast_to(b_h_ref[...], (tile_n, hp))

    def step(h):
        g = jnp.dot(h.astype(wd), u_rz,
                    preferred_element_type=jnp.float32) + b_rz
        r = jax.nn.sigmoid(g[:, :hp])
        z = jax.nn.sigmoid(g[:, hp:])
        h_tilde = jnp.tanh(
            jnp.dot((h * r).astype(wd), u_h,
                    preferred_element_type=jnp.float32) + b_h)
        return h + dt * (1.0 - z) * (h_tilde - h)

    h = h_ref[...]
    if n_steps == 1:
        h = step(h)
    else:
        h = lax.fori_loop(0, n_steps, lambda _, hh: step(hh), h,
                          unroll=(n_steps <= 8))
    out_ref[...] = h


# ----------------------------------------------------------------------------
# pallas_call wrappers
# ----------------------------------------------------------------------------
def gru_bayes_update(obs_mask, mgn_h, joint_h, p, *, max_row_tile=256):
    n, hp = joint_h.shape
    dp = mgn_h.shape[1]
    tile_n = _pick_row_tile(n, max_row_tile)
    return pl.pallas_call(
        _gru_update_kernel,
        out_shape=jax.ShapeDtypeStruct((n, hp), jnp.float32),
        grid=(n // tile_n,),
        in_specs=[
            pl.BlockSpec((tile_n, 1), lambda i: (i, 0)),        # obs mask
            pl.BlockSpec((tile_n, dp), lambda i: (i, 0)),       # mgn_h tile
            pl.BlockSpec((tile_n, hp), lambda i: (i, 0)),       # joint_h tile
            pl.BlockSpec((dp, 3 * hp), lambda i: (0, 0)),       # W_rzh (resident)
            pl.BlockSpec((hp, 2 * hp), lambda i: (0, 0)),       # U_rz  (resident)
            pl.BlockSpec((hp, hp), lambda i: (0, 0)),           # U_h   (resident)
            pl.BlockSpec((1, 3 * hp), lambda i: (0, 0)),        # b_rzh
        ],
        out_specs=pl.BlockSpec((tile_n, hp), lambda i: (i, 0)),
        compiler_params=pltpu.CompilerParams(
            dimension_semantics=("parallel",),
            # headroom under v7x's 64 MiB VMEM; v5e/v6e have 128 MiB.
            vmem_limit_bytes=48 * 1024 * 1024),
    )(obs_mask, mgn_h, joint_h,
      p['W_rzh'], p['U_rz'], p['U_h'], p['b_rzh'])


def gruode_euler_steps(joint_h, delta_t, p, *, n_steps=1, max_row_tile=256):
    n, hp = joint_h.shape
    tile_n = _pick_row_tile(n, max_row_tile)
    dt_arr = jnp.asarray(delta_t, jnp.float32).reshape(1, 1)
    kernel = functools.partial(_gruode_kernel, n_steps=n_steps)
    return pl.pallas_call(
        kernel,
        out_shape=jax.ShapeDtypeStruct((n, hp), jnp.float32),
        grid=(n // tile_n,),
        in_specs=[
            pl.BlockSpec(memory_space=pltpu.MemorySpace.SMEM),  # dt scalar (1,1)
            pl.BlockSpec((tile_n, hp), lambda i: (i, 0)),       # joint_h tile
            pl.BlockSpec((hp, 2 * hp), lambda i: (0, 0)),       # U_rz (resident)
            pl.BlockSpec((hp, hp), lambda i: (0, 0)),           # U_h  (resident)
            pl.BlockSpec((1, 2 * hp), lambda i: (0, 0)),        # b_rz
            pl.BlockSpec((1, hp), lambda i: (0, 0)),            # b_h
        ],
        out_specs=pl.BlockSpec((tile_n, hp), lambda i: (i, 0)),
        compiler_params=pltpu.CompilerParams(
            dimension_semantics=("parallel",),
            vmem_limit_bytes=48 * 1024 * 1024),
    )(dt_arr, joint_h, p['U_rz'], p['U_h'], p['b_rz'], p['b_h'])


# ----------------------------------------------------------------------------
# Parameter init (mirrors reset_parameters) + fused/padded packing
# ----------------------------------------------------------------------------
def _xavier_uniform(key, shape):
    fan_in, fan_out = shape
    limit = (6.0 / (fan_in + fan_out)) ** 0.5
    return jax.random.uniform(key, shape, jnp.float32, -limit, limit)


def _orthogonal(key, n):
    a = jax.random.normal(key, (n, n), jnp.float32)
    q, r = jnp.linalg.qr(a)
    q = q * jnp.sign(jnp.diag(r))[None, :]
    return q


def init_joint_cell_params(key, input_size, joint_hidden_size, n_dim):
    """Raw (PyTorch-layout) parameters: xavier W, orthogonal U, zero b."""
    k = jax.random.split(key, 9)
    in_dim = input_size * n_dim
    h = joint_hidden_size
    gru = {
        'W_r': _xavier_uniform(k[0], (in_dim, h)),
        'W_z': _xavier_uniform(k[1], (in_dim, h)),
        'W_h': _xavier_uniform(k[2], (in_dim, h)),
        'U_r': _orthogonal(k[3], h),
        'U_z': _orthogonal(k[4], h),
        'U_h': _orthogonal(k[5], h),
        'b_r': jnp.zeros((1, h), jnp.float32),
        'b_z': jnp.zeros((1, h), jnp.float32),
        'b_h': jnp.zeros((1, h), jnp.float32),
    }
    ode = {
        'U_r': _orthogonal(k[6], h),
        'U_z': _orthogonal(k[7], h),
        'U_h': _orthogonal(k[8], h),
        'b_r': jnp.zeros((1, h), jnp.float32),
        'b_z': jnp.zeros((1, h), jnp.float32),
        'b_h': jnp.zeros((1, h), jnp.float32),
    }
    return {'gru': gru, 'ode': ode}


def _pad2d(x, rows, cols):
    r, c = x.shape
    return jnp.pad(x, ((0, rows - r), (0, cols - c)))


def prepare_params(raw, weight_dtype=jnp.float32):
    """Fuse per-gate weights and pad to lane-dense TPU shapes.

    weight_dtype=jnp.bfloat16 halves the weight footprint and doubles MXU
    throughput on v6e/v7x (elementwise epilogue stays f32); keep float32 on
    v5e / for bit-accurate checks.
    """
    h = raw['gru']['U_r'].shape[0]
    d = raw['gru']['W_r'].shape[0]
    hp = _round_up(h, LANE)
    dp = _round_up(d, LANE)

    def pw(w):  # (d, h) -> (dp, hp)
        return _pad2d(w, dp, hp)

    def pu(u):  # (h, h) -> (hp, hp)
        return _pad2d(u, hp, hp)

    def pb(b):  # (1, h) -> (1, hp)
        return _pad2d(b.reshape(1, -1), 1, hp)

    g, o = raw['gru'], raw['ode']
    gru = {
        'W_rzh': jnp.concatenate([pw(g['W_r']), pw(g['W_z']), pw(g['W_h'])],
                                 axis=1).astype(weight_dtype),
        'U_rz': jnp.concatenate([pu(g['U_r']), pu(g['U_z'])],
                                axis=1).astype(weight_dtype),
        'U_h': pu(g['U_h']).astype(weight_dtype),
        'b_rzh': jnp.concatenate([pb(g['b_r']), pb(g['b_z']), pb(g['b_h'])],
                                 axis=1),
    }
    ode = {
        'U_rz': jnp.concatenate([pu(o['U_r']), pu(o['U_z'])],
                                axis=1).astype(weight_dtype),
        'U_h': pu(o['U_h']).astype(weight_dtype),
        'b_rz': jnp.concatenate([pb(o['b_r']), pb(o['b_z'])], axis=1),
        'b_h': pb(o['b_h']),
    }
    return {'gru': gru, 'ode': ode}


def pad_state(x, row_mult=SUBLANE, col_mult=LANE):
    """Pad (rows, feats) activations once; padded rows/cols stay zero forever."""
    r, c = x.shape
    return jnp.pad(x, ((0, _round_up(r, row_mult) - r),
                       (0, _round_up(c, col_mult) - c)))


# ----------------------------------------------------------------------------
# joint_Cell forward (operates on TPU-padded state)
# ----------------------------------------------------------------------------
@functools.partial(jax.jit, static_argnames=('update', 'n_euler_steps'))
def joint_cell_forward(params, current_time, joint_h, delta_t,
                       mgn_h=None, i_obs=None, update=False, n_euler_steps=1):
    """joint_Cell.forward.

    update=True : joint_GRUBayes (GRU update on rows listed in i_obs).
    update=False: odeint(joint_GRUODE, h, [t, t+dt], method='euler')[-1];
                  n_euler_steps > 1 fuses that many repeated Euler calls.
    """
    if update:
        assert i_obs is not None and mgn_h is not None
        n_rows = joint_h.shape[0]
        obs_mask = jnp.zeros((n_rows,), jnp.float32).at[i_obs].set(1.0)[:, None]
        return gru_bayes_update(obs_mask, mgn_h, joint_h, params['gru'])
    else:
        del current_time  # joint_GRUODE.forward ignores t
        return gruode_euler_steps(joint_h, delta_t, params['ode'],
                                  n_steps=n_euler_steps)


# ----------------------------------------------------------------------------
# Pure-jnp references (unpadded, per-gate) for validation
# ----------------------------------------------------------------------------
def _ref_gru(m, h, p):
    r = jax.nn.sigmoid(m @ p['W_r'] + h @ p['U_r'] + p['b_r'])
    z = jax.nn.sigmoid(m @ p['W_z'] + h @ p['U_z'] + p['b_z'])
    ht = jnp.tanh(m @ p['W_h'] + (h * r) @ p['U_h'] + p['b_h'])
    return ht + z * (h - ht)


def _ref_ode_step(h, dt, p):
    r = jax.nn.sigmoid(h @ p['U_r'] + p['b_r'])
    z = jax.nn.sigmoid(h @ p['U_z'] + p['b_z'])
    ht = jnp.tanh((h * r) @ p['U_h'] + p['b_h'])
    return h + dt * (1.0 - z) * (ht - h)


if __name__ == "__main__":
    key = jax.random.PRNGKey(0)
    input_size = 4
    n_dim = 2
    joint_hidden_size = 32
    batch = 24

    kp, kh, km = jax.random.split(key, 3)
    raw = init_joint_cell_params(kp, input_size, joint_hidden_size, n_dim)
    params = prepare_params(raw)   # f32; pass weight_dtype=jnp.bfloat16 on v6e/v7x

    joint_h = jax.random.normal(kh, (batch, joint_hidden_size), jnp.float32)
    mgn_h = jax.random.normal(km, (batch, input_size * n_dim), jnp.float32)
    i_obs = jnp.array([1, 3, 5, 20], dtype=jnp.int32)

    current_time = 0.0
    delta_t = 0.1
    H = joint_hidden_size

    # Pad once; padded state is carried across all calls.
    joint_h_p = pad_state(joint_h)   # (24, 128)
    mgn_h_p = pad_state(mgn_h)       # (24, 128)

    # --- ODE propagation branch (update=False), single Euler step ---
    h_ode_p = joint_cell_forward(params, current_time, joint_h_p, delta_t)
    h_ode = jax.block_until_ready(h_ode_p)[:batch, :H]
    ref_ode = _ref_ode_step(joint_h, delta_t, raw['ode'])
    assert jnp.allclose(h_ode, ref_ode, atol=1e-4, rtol=1e-4), "ODE step mismatch"

    # --- Fused multi-step Euler propagation (3 repeated calls fused in-kernel) ---
    h_ode3_p = joint_cell_forward(params, current_time, joint_h_p, delta_t,
                                  n_euler_steps=3)
    h_ode3 = jax.block_until_ready(h_ode3_p)[:batch, :H]
    ref3 = joint_h
    for _ in range(3):
        ref3 = _ref_ode_step(ref3, delta_t, raw['ode'])
    assert jnp.allclose(h_ode3, ref3, atol=1e-4, rtol=1e-4), "fused Euler mismatch"

    # --- Bayes update branch (update=True) ---
    h_upd_p = joint_cell_forward(params, current_time, joint_h_p, delta_t,
                                 mgn_h=mgn_h_p, i_obs=i_obs, update=True)
    h_upd = jax.block_until_ready(h_upd_p)[:batch, :H]
    ref_upd = joint_h.at[i_obs].set(
        _ref_gru(mgn_h[i_obs], joint_h[i_obs], raw['gru']))
    assert jnp.allclose(h_upd, ref_upd, atol=1e-4, rtol=1e-4), "Bayes update mismatch"

    # Exercise the multi-tile row grid explicitly (8-row tiles -> grid=(3,)).
    h_small = gruode_euler_steps(joint_h_p, delta_t, params['ode'],
                                 n_steps=1, max_row_tile=8)
    h_small = jax.block_until_ready(h_small)[:batch, :H]
    assert jnp.allclose(h_small, ref_ode, atol=1e-4, rtol=1e-4), "tiled grid mismatch"

    print("KERNEL_OK")
</pallas_src>

<mosaic_0001>
module attributes {stable_mosaic.version = 11 : i64} {
  func.func @_gruode_kernel(%arg0: i32, %arg1: memref<1x1xf32, #tpu.memory_space<smem>>, %arg2: memref<24x128xf32, #tpu.memory_space<vmem>>, %arg3: memref<128x256xf32, #tpu.memory_space<vmem>>, %arg4: memref<128x128xf32, #tpu.memory_space<vmem>>, %arg5: memref<1x256xf32, #tpu.memory_space<vmem>>, %arg6: memref<1x128xf32, #tpu.memory_space<vmem>>, %arg7: memref<24x128xf32, #tpu.memory_space<vmem>>) attributes {dimension_semantics = [#tpu.dimension_semantics<parallel>], iteration_bounds = array<i64: 1>, scalar_prefetch = 0 : i64, scratch_operands = 0 : i64, tpu.core_type = #tpu.core_type<tc>, window_params = [{transform_indices = @transform_0, window_bounds = array<i64: 1, 1>}, {transform_indices = @transform_1, window_bounds = array<i64: 24, 128>}, {pipeline_mode = #tpu.pipeline_mode<synchronous>, transform_indices = @transform_2, window_bounds = array<i64: 128, 256>}, {pipeline_mode = #tpu.pipeline_mode<synchronous>, transform_indices = @transform_3, window_bounds = array<i64: 128, 128>}, {pipeline_mode = #tpu.pipeline_mode<synchronous>, transform_indices = @transform_4, window_bounds = array<i64: 1, 256>}, {pipeline_mode = #tpu.pipeline_mode<synchronous>, transform_indices = @transform_5, window_bounds = array<i64: 1, 128>}, {transform_indices = @transform_6, window_bounds = array<i64: 24, 128>}]} {
    %c0 = arith.constant 0 : index
    %c0_0 = arith.constant 0 : index
    %0 = memref.load %arg1[%c0, %c0_0] : memref<1x1xf32, #tpu.memory_space<smem>>
    %c0_1 = arith.constant 0 : index
    %c0_2 = arith.constant 0 : index
    %1 = vector.load %arg3[%c0_1, %c0_2] : memref<128x256xf32, #tpu.memory_space<vmem>>, vector<128x256xf32>
    %c0_3 = arith.constant 0 : index
    %c0_4 = arith.constant 0 : index
    %2 = vector.load %arg4[%c0_3, %c0_4] : memref<128x128xf32, #tpu.memory_space<vmem>>, vector<128x128xf32>
    %c0_5 = arith.constant 0 : index
    %c0_6 = arith.constant 0 : index
    %3 = vector.load %arg5[%c0_5, %c0_6] : memref<1x256xf32, #tpu.memory_space<vmem>>, vector<1x256xf32>
    %4 = vector.shape_cast %3 : vector<1x256xf32> to vector<1x256xf32>
    %5 = vector.broadcast %4 : vector<1x256xf32> to vector<24x256xf32>
    %c0_7 = arith.constant 0 : index
    %c0_8 = arith.constant 0 : index
    %6 = vector.load %arg6[%c0_7, %c0_8] : memref<1x128xf32, #tpu.memory_space<vmem>>, vector<1x128xf32>
    %7 = vector.shape_cast %6 : vector<1x128xf32> to vector<1x128xf32>
    %8 = vector.broadcast %7 : vector<1x128xf32> to vector<24x128xf32>
    %c0_9 = arith.constant 0 : index
    %c0_10 = arith.constant 0 : index
    %9 = vector.load %arg2[%c0_9, %c0_10] : memref<24x128xf32, #tpu.memory_space<vmem>>, vector<24x128xf32>
    %cst = arith.constant dense<0.000000e+00> : vector<24x256xf32>
    %10 = tpu.matmul %9, %1, %cst {dimension_numbers = #tpu.dot_dimension_numbers<[1], [0], [0], [1], [0, 0, 1, 1], [], []>} : vector<24x128xf32>, vector<128x256xf32>, vector<24x256xf32> -> vector<24x256xf32>
    %11 = arith.addf %10, %5 : vector<24x256xf32>
    %12 = vector.extract_strided_slice %11 {offsets = [0, 0], sizes = [24, 128], strides = [1, 1]} : vector<24x256xf32> to vector<24x128xf32>
    %13 = arith.negf %12 : vector<24x128xf32>
    %14 = math.exp %13 : vector<24x128xf32>
    %cst_11 = arith.constant 1.000000e+00 : f32
    %15 = vector.broadcast %cst_11 : f32 to vector<24x128xf32>
    %16 = arith.addf %15, %14 : vector<24x128xf32>
    %17 = arith.divf %15, %16 : vector<24x128xf32>
    %18 = vector.extract_strided_slice %11 {offsets = [0, 128], sizes = [24, 128], strides = [1, 1]} : vector<24x256xf32> to vector<24x128xf32>
    %19 = arith.negf %18 : vector<24x128xf32>
    %20 = math.exp %19 : vector<24x128xf32>
    %cst_12 = arith.constant 1.000000e+00 : f32
    %21 = vector.broadcast %cst_12 : f32 to vector<24x128xf32>
    %22 = arith.addf %21, %20 : vector<24x128xf32>
    %23 = arith.divf %21, %22 : vector<24x128xf32>
    %24 = arith.mulf %9, %17 : vector<24x128xf32>
    %cst_13 = arith.constant dense<0.000000e+00> : vector<24x128xf32>
    %25 = tpu.matmul %24, %2, %cst_13 {dimension_numbers = #tpu.dot_dimension_numbers<[1], [0], [0], [1], [0, 0, 1, 1], [], []>} : vector<24x128xf32>, vector<128x128xf32>, vector<24x128xf32> -> vector<24x128xf32>
    %26 = arith.addf %25, %8 : vector<24x128xf32>
    %27 = math.tanh %26 : vector<24x128xf32>
    %cst_14 = arith.constant 1.000000e+00 : f32
    %28 = vector.broadcast %cst_14 : f32 to vector<24x128xf32>
    %29 = arith.subf %28, %23 : vector<24x128xf32>
    %30 = vector.broadcast %0 : f32 to vector<24x128xf32>
    %31 = arith.mulf %30, %29 : vector<24x128xf32>
    %32 = arith.subf %27, %9 : vector<24x128xf32>
    %33 = arith.mulf %31, %32 : vector<24x128xf32>
    %34 = arith.addf %9, %33 : vector<24x128xf32>
    %c0_15 = arith.constant 0 : index
    %c0_16 = arith.constant 0 : index
    %35 = vector.load %arg7[%c0_15, %c0_16] : memref<24x128xf32, #tpu.memory_space<vmem>>, vector<24x128xf32>
    tpu.vector_store %arg7[%c0_15, %c0_16], %34 {strides = array<i32>} : memref<24x128xf32, #tpu.memory_space<vmem>>, vector<24x128xf32>,
    return
  }
  func.func @transform_0(%arg0: i32) -> (i32, i32) {
    %c0_i32 = arith.constant 0 : i32
    %c0_i32_0 = arith.constant 0 : i32
    %c0_i32_1 = arith.constant 0 : i32
    return %c0_i32, %c0_i32_0 : i32, i32
  }
  func.func @transform_1(%arg0: i32) -> (i32, i32) {
    %c0_i32 = arith.constant 0 : i32
    %c0_i32_0 = arith.constant 0 : i32
    return %arg0, %c0_i32 : i32, i32
  }
  func.func @transform_2(%arg0: i32) -> (i32, i32) {
    %c0_i32 = arith.constant 0 : i32
    %c0_i32_0 = arith.constant 0 : i32
    %c0_i32_1 = arith.constant 0 : i32
    return %c0_i32, %c0_i32_0 : i32, i32
  }
  func.func @transform_3(%arg0: i32) -> (i32, i32) {
    %c0_i32 = arith.constant 0 : i32
    %c0_i32_0 = arith.constant 0 : i32
    %c0_i32_1 = arith.constant 0 : i32
    return %c0_i32, %c0_i32_0 : i32, i32
  }
  func.func @transform_4(%arg0: i32) -> (i32, i32) {
    %c0_i32 = arith.constant 0 : i32
    %c0_i32_0 = arith.constant 0 : i32
    %c0_i32_1 = arith.constant 0 : i32
    return %c0_i32, %c0_i32_0 : i32, i32
  }
  func.func @transform_5(%arg0: i32) -> (i32, i32) {
    %c0_i32 = arith.constant 0 : i32
    %c0_i32_0 = arith.constant 0 : i32
    %c0_i32_1 = arith.constant 0 : i32
    return %c0_i32, %c0_i32_0 : i32, i32
  }
  func.func @transform_6(%arg0: i32) -> (i32, i32) {
    %c0_i32 = arith.constant 0 : i32
    %c0_i32_0 = arith.constant 0 : i32
    return %arg0, %c0_i32 : i32, i32
  }
}

</mosaic_0001>

<bundles_post_ra>
// kernel: joint_cell_forward.1
= control target key start
LH: loop header
LB: loop body
LE: loop exit
PB: predicated region body
PF: predicated region fallthrough
CT: control target
= control target key end

     0   :  { %12 = vsyncpa [#allocation4], 0  ;;  %s690_s0 = inlined_call_operand.<no memory space> [shape: f32[1,1], index: 0, kind: input, shape index: {}]   ;;  %s691_s1 = inlined_call_operand.hbm [shape: f32[24,128], index: 1, kind: input, shape index: {}]   ;;  %s692_s2 = inlined_call_operand.hbm [shape: f32[128,256], index: 2, kind: input, shape index: {}]   ;;  %s693_s3 = inlined_call_operand.hbm [shape: f32[128,128], index: 3, kind: input, shape index: {}]   ;;  %s694_s4 = inlined_call_operand.vmem [shape: f32[1,256], index: 4, kind: input, shape index: {}]   ;;  %s695_s5 = inlined_call_operand.vmem [shape: f32[1,128], index: 5, kind: input, shape index: {}]   ;;  %s696_s6 = inlined_call_operand.hbm [shape: f32[24,128], index: 6, kind: output, shape index: {}]  }
   0x1   :  { %13 = vsyncpa [#allocation7], 0 }
   0x2   :  { %14 = vsyncpa [#allocation5], 0  ;;  %s572_s21 = smov [#allocation6]  }
   0x3   :  { %s34_s22 = sshll.u32 %s572_s21, 4  ;;  %s35_s22 = int_to_ptr.vmem [resolvable:$true] %s34_s22 }
   0x4   :  { %s494_s23 = scalar_lea.vmem %s35_s22, 4096  ;;  %p499_p1 = scmp.lt.s32.totalorder %s35_s22, %s35_s22 }
   0x5   :  { %p495_p0 = scmp.ne.s32.totalorder %s35_s22, %s494_s23  ;;  %p500_p2 = scmp.lt.s32.totalorder %s494_s23, %s494_s23 }
   0x7   :  { %p501_p3 = por %p500_p2, %p499_p1 }
   0x9   :  { %p502_p4 = pnand %p501_p3, %p495_p0 }
   0xb   :  { %505 = shalt.err (!%p502_p4)
}
   0xc   :  { %s573_s24 = smov 256   ;;  %s574_s25 = smov 16  }
   0xd   :  { %40 = dma.hbm_to_vmem [thread:$0]  %s692_s2, 4096, %s35_s22, [#allocation7], %s573_s24, %s573_s24, %s574_s25  }
   0xe   :  { %s575_s28 = smov [#allocation3]  }
   0xf   :  { %s22_s29 = sshll.u32 %s575_s28, 4  ;;  %s23_s29 = int_to_ptr.vmem [resolvable:$true] %s22_s29 }
  0x10   :  { %s514_s30 = scalar_lea.vmem %s23_s29, 384  ;;  %p519_p6 = scmp.lt.s32.totalorder %s23_s29, %s23_s29 }
  0x11   :  { %p515_p5 = scmp.ne.s32.totalorder %s23_s29, %s514_s30  ;;  %p520_p7 = scmp.lt.s32.totalorder %s514_s30, %s514_s30 }
  0x13   :  { %p521_p8 = por %p520_p7, %p519_p6 }
  0x15   :  { %p522_p9 = pnand %p521_p8, %p515_p5 }
  0x17   :  { %525 = shalt.err (!%p522_p9)
}
  0x18   :  { %s576_s7 = smov 128   ;;  %s577_s8 = smov 8  }
  0x19   :  { %28 = dma.hbm_to_vmem [thread:$0]  %s691_s1, 384, %s23_s29, [#allocation4], %s576_s7, %s576_s7, %s577_s8  }
  0x1a   :  { %s578_s2 = smov [#allocation8]  }
  0x1b   :  { %s46_s11 = sshll.u32 %s578_s2, 4  ;;  %s47_s11 = int_to_ptr.vmem [resolvable:$true] %s46_s11 }
  0x1c   :  { %s534_s12 = scalar_lea.vmem %s47_s11, 2048  ;;  %p539_p11 = scmp.lt.s32.totalorder %s47_s11, %s47_s11 }
  0x1d   :  { %p535_p10 = scmp.ne.s32.totalorder %s47_s11, %s534_s12  ;;  %p540_p12 = scmp.lt.s32.totalorder %s534_s12, %s534_s12 }
  0x1f   :  { %p541_p13 = por %p540_p12, %p539_p11 }
  0x21   :  { %p542_p0 = pnand %p541_p13, %p535_p10 }
  0x23   :  { %545 = shalt.err (!%p542_p0)
}
  0x24   :  { %52 = dma.hbm_to_vmem [thread:$0]  %s693_s3, 2048, %s47_s11, [#allocation7], %s576_s7, %s576_s7, %s577_s8  }
  0x25   :  { %566 = dma.done.wait [#allocation4], 384  }
  0x26   :  { %567 = vsyncadd [#allocation4], 4294966912 }
  0x27   :  { %568 = dma.done.wait [#allocation7], 6144  }
  0x28   :  { %569 = vsyncadd [#allocation7], 4294961152  ;;  %v579_v0 = vmov 0.0   ;;  %v98_v1 = vld [vmem:[#allocation6 + $0xf8] sm:$0xff]  ;;  %v97_v2 = vld [vmem:[#allocation6 + $0xf0] sm:$0xff]  ;;  %vm580_vm0 = vmmov 0   ;;  %v117_v52 = vlaneseq }
  0x29   :  { %201 = vmatprep.mubr.f32.mxu0 %v579_v0  ;;  %405 = vmatprep.subr.mxu1 %v579_v0  ;;  %v96_v3 = vld [vmem:[#allocation6 + $0xe8] sm:$0xff]  ;;  %v95_v4 = vld [vmem:[#allocation6 + $0xe0] sm:$0xff]  ;;  %v94_v5 = vld [vmem:[#allocation6 + $0xd8] sm:$0xff] }
  0x2a   :  { %137 = vmatprep.subr.mxu0 %v98_v1  ;;  %v93_v6 = vld [vmem:[#allocation6 + $0xd0] sm:$0xff]  ;;  %v92_v7 = vld [vmem:[#allocation6 + $0xc8] sm:$0xff]  ;;  %v91_v8 = vld [vmem:[#allocation6 + $0xc0] sm:$0xff]  ;;  %437 = vmatprep.mubr.msk.f32.mxu1 %vm580_vm0, %v579_v0  ;;  %v118_v53 = vshrl.u32 %v117_v52, 7 }
  0x2b   :  { %138 = vmatpush1.msra.mxu0 %v97_v2  ;;  %v90_v9 = vld [vmem:[#allocation6 + $0xb8] sm:$0xff]  ;;  %v89_v10 = vld [vmem:[#allocation6 + $0xb0] sm:$0xff]  ;;  %v88_v11 = vld [vmem:[#allocation6 + $0xa8] sm:$0xff] }
  0x2c   :  { %139 = vmatprep.subr.mxu0 %v96_v3  ;;  %v87_v12 = vld [vmem:[#allocation6 + $0xa0] sm:$0xff]  ;;  %v86_v13 = vld [vmem:[#allocation6 + $0x98] sm:$0xff]  ;;  %v85_v14 = vld [vmem:[#allocation6 + $0x90] sm:$0xff]  ;;  %v119_v54 = vsub.s32 0, %v118_v53 }
  0x2d   :  { %140 = vmatpush1.msra.mxu0 %v95_v4  ;;  %v84_v15 = vld [vmem:[#allocation6 + $0x88] sm:$0xff]  ;;  %v83_v16 = vld [vmem:[#allocation6 + $0x80] sm:$0xff]  ;;  %v82_v17 = vld [vmem:[#allocation6 + $0x78] sm:$0xff] }
  0x2e   :  { %141 = vmatprep.subr.mxu0 %v94_v5  ;;  %v81_v18 = vld [vmem:[#allocation6 + $0x70] sm:$0xff]  ;;  %v80_v19 = vld [vmem:[#allocation6 + $0x68] sm:$0xff]  ;;  %v79_v20 = vld [vmem:[#allocation6 + $0x60] sm:$0xff] }
  0x2f   :  { %142 = vmatpush1.msra.mxu0 %v93_v6  ;;  %v78_v21 = vld [vmem:[#allocation6 + $0x58] sm:$0xff]  ;;  %v77_v22 = vld [vmem:[#allocation6 + $0x50] sm:$0xff]  ;;  %v76_v23 = vld [vmem:[#allocation6 + $0x48] sm:$0xff] }
  0x30   :  { %143 = vmatprep.subr.mxu0 %v92_v7  ;;  %v75_v24 = vld [vmem:[#allocation6 + $0x40] sm:$0xff]  ;;  %v74_v25 = vld [vmem:[#allocation6 + $0x38] sm:$0xff]  ;;  %v73_v26 = vld [vmem:[#allocation6 + $0x30] sm:$0xff] }
  0x31   :  { %144 = vmatpush1.msra.mxu0 %v91_v8  ;;  %v72_v27 = vld [vmem:[#allocation6 + $0x28] sm:$0xff]  ;;  %v71_v28 = vld [vmem:[#allocation6 + $0x20] sm:$0xff]  ;;  %v70_v29 = vld [vmem:[#allocation6 + $0x18] sm:$0xff] }
  0x32   :  { %145 = vmatprep.subr.mxu0 %v90_v9  ;;  %v69_v30 = vld [vmem:[#allocation6 + $0x10] sm:$0xff]  ;;  %v68_v31 = vld [vmem:[#allocation6 + $0x8] sm:$0xff]  ;;  %v67_v32 = vld [vmem:[#allocation6] sm:$0xff] }
  0x33   :  { %146 = vmatpush1.msra.mxu0 %v89_v10  ;;  %v634_v33 = vld [vmem:[#allocation3] sm:$0xff]  ;;  %v638_v34 = vld [vmem:[#allocation3 + $0x8] sm:$0xff]  ;;  %v642_v35 = vld [vmem:[#allocation3 + $0x10] sm:$0xff] }
  0x34   :  { %147 = vmatprep.subr.mxu0 %v88_v11  ;;  %v114_v36 = vld [vmem:[#allocation8 + $0x78] sm:$0xff]  ;;  %v113_v37 = vld [vmem:[#allocation8 + $0x70] sm:$0xff]  ;;  %v112_v38 = vld [vmem:[#allocation8 + $0x68] sm:$0xff] }
  0x35   :  { %148 = vmatpush1.msra.mxu0 %v87_v12  ;;  %406 = vmatpush3.msra.mxu1 %v114_v36  ;;  %v111_v39 = vld [vmem:[#allocation8 + $0x60] sm:$0xff]  ;;  %v110_v40 = vld [vmem:[#allocation8 + $0x58] sm:$0xff]  ;;  %v109_v41 = vld [vmem:[#allocation8 + $0x50] sm:$0xff] }
  0x36   :  { %149 = vmatprep.subr.mxu0 %v86_v13  ;;  %407 = vmatprep.subr.mxu1 %v579_v0  ;;  %v108_v42 = vld [vmem:[#allocation8 + $0x48] sm:$0xff]  ;;  %v107_v43 = vld [vmem:[#allocation8 + $0x40] sm:$0xff]  ;;  %v106_v44 = vld [vmem:[#allocation8 + $0x38] sm:$0xff] }
  0x37   :  { %150 = vmatpush1.msra.mxu0 %v85_v14  ;;  %408 = vmatpush3.msra.mxu1 %v113_v37  ;;  %v105_v45 = vld [vmem:[#allocation8 + $0x30] sm:$0xff]  ;;  %v104_v46 = vld [vmem:[#allocation8 + $0x28] sm:$0xff]  ;;  %v103_v47 = vld [vmem:[#allocation8 + $0x20] sm:$0xff] }
  0x38   :  { %151 = vmatprep.subr.mxu0 %v84_v15  ;;  %409 = vmatprep.subr.mxu1 %v579_v0  ;;  %v102_v48 = vld [vmem:[#allocation8 + $0x18] sm:$0xff]  ;;  %v101_v49 = vld [vmem:[#allocation8 + $0x10] sm:$0xff]  ;;  %v100_v50 = vld [vmem:[#allocation8 + $0x8] sm:$0xff] }
  0x39   :  { %152 = vmatpush1.msra.mxu0 %v83_v16  ;;  %410 = vmatpush3.msra.mxu1 %v112_v38  ;;  %v99_v51 = vld [vmem:[#allocation8] sm:$0xff]  ;;  %v115_v55 = vld [vmem:[%s694_s4] sm:$0x3] }
  0x3a   :  { %153 = vmatprep.subr.mxu0 %v82_v17  ;;  %411 = vmatprep.subr.mxu1 %v579_v0  ;;  %v120_v56 = vrot.slane %v115_v55, %v119_v54  ;;  %v123_v17 = vsub.s32 1, %v118_v53 }
  0x3b   :  { %154 = vmatpush1.msra.mxu0 %v81_v18  ;;  %412 = vmatpush3.msra.mxu1 %v111_v39 }
  0x3c   :  { %155 = vmatprep.subr.mxu0 %v80_v19  ;;  %413 = vmatprep.subr.mxu1 %v579_v0  ;;  %v124_v18 = vrot.slane %v115_v55, %v123_v17 }
  0x3d   :  { %156 = vmatpush1.msra.mxu0 %v79_v20  ;;  %414 = vmatpush3.msra.mxu1 %v110_v40 }
  0x3e   :  { %157 = vmatprep.subr.mxu0 %v78_v21  ;;  %415 = vmatprep.subr.mxu1 %v579_v0 }
  0x3f   :  { %158 = vmatpush1.msra.mxu0 %v77_v22  ;;  %416 = vmatpush3.msra.mxu1 %v109_v41 }
  0x40   :  { %159 = vmatprep.subr.mxu0 %v76_v23  ;;  %417 = vmatprep.subr.mxu1 %v579_v0 }
  0x41   :  { %160 = vmatpush1.msra.mxu0 %v75_v24  ;;  %418 = vmatpush3.msra.mxu1 %v108_v42 }
  0x42   :  { %161 = vmatprep.subr.mxu0 %v74_v25  ;;  %419 = vmatprep.subr.mxu1 %v579_v0 }
  0x43   :  { %162 = vmatpush1.msra.mxu0 %v73_v26  ;;  %420 = vmatpush3.msra.mxu1 %v107_v43 }
  0x44   :  { %163 = vmatprep.subr.mxu0 %v72_v27  ;;  %421 = vmatprep.subr.mxu1 %v579_v0 }
  0x45   :  { %164 = vmatpush1.msra.mxu0 %v71_v28  ;;  %422 = vmatpush3.msra.mxu1 %v106_v44 }
  0x46   :  { %165 = vmatprep.subr.mxu0 %v70_v29  ;;  %423 = vmatprep.subr.mxu1 %v579_v0 }
  0x47   :  { %166 = vmatpush1.msra.mxu0 %v69_v30  ;;  %424 = vmatpush3.msra.mxu1 %v105_v45  ;;  %v379_v30 = vld [vmem:[%s695_s5] ss:$0 sm:$0xff] }
  0x48   :  { %167 = vmatprep.subr.mxu0 %v68_v31  ;;  %425 = vmatprep.subr.mxu1 %v579_v0 }
  0x49   :  { %168 = vmatpush1.msra.mxu0 %v67_v32  ;;  %426 = vmatpush3.msra.mxu1 %v104_v46 }
  0x4a   :  { %202 = vmatmul.mubr.f32.vlgmr.msra.gmra.mxu0 %v634_v33  ;;  %427 = vmatprep.subr.mxu1 %v579_v0 }
  0x4b   :  { %207 = vmatprep.mubr.f32.mxu0 %v579_v0  ;;  %428 = vmatpush3.msra.mxu1 %v103_v47  ;;  %v345_v47 = vstv %s690_s0  ;;  %s581_s0 = smov [#allocation9]  }
  0x4c   :  { %429 = vmatprep.subr.mxu1 %v579_v0  ;;  %s366_s17 = sshll.u32 %s581_s0, 4  ;;  %s367_s17 = int_to_ptr.vmem [resolvable:$true] %s366_s17 }
  0x4d   :  { %430 = vmatpush3.msra.mxu1 %v102_v48  ;;  %s546_s18 = scalar_lea.vmem %s367_s17, 384  ;;  %p551_p2 = scmp.lt.s32.totalorder %s367_s17, %s367_s17 }
  0x4e   :  { %208 = vmatmul.mubr.f32.gmra.mxu0 %v638_v34  ;;  %431 = vmatprep.subr.mxu1 %v579_v0  ;;  %p547_p1 = scmp.ne.s32.totalorder %s367_s17, %s546_s18  ;;  %p552_p3 = scmp.lt.s32.totalorder %s546_s18, %s546_s18 }
  0x4f   :  { %213 = vmatprep.mubr.f32.mxu0 %v579_v0  ;;  %432 = vmatpush3.msra.mxu1 %v101_v49 }
  0x50   :  { %433 = vmatprep.subr.mxu1 %v579_v0  ;;  %p553_p4 = por %p552_p3, %p551_p2 }
  0x51   :  { %434 = vmatpush3.msra.mxu1 %v100_v50 }
  0x52   :  { %214 = vmatmul.mubr.f32.gmra.mxu0 %v642_v35  ;;  %435 = vmatprep.subr.mxu1 %v579_v0  ;;  %p554_p5 = pnand %p553_p4, %p547_p1 }
  0x53   :  { %436 = vmatpush3.msra.mxu1 %v99_v51 }
 0x10a   :  { %v203_v57 = vpop.f32.mrf.mxu0 }
 0x10b   :  { %v204_v58 = vadd.f32 %v203_v57, %v120_v56 }
 0x10c   :  { %v205_v59 = vpop.f32.mrf.mxu0 }
 0x10d   :  { %v380_v60 = vmul.f32 -1.442695, %v204_v58  ;;  %v206_v19 = vadd.f32 %v205_v59, %v124_v18 }
 0x10e   :  { %v209_v61 = vpop.f32.mrf.mxu0 }
 0x10f   :  { %456 = vpow2.f32 %v380_v60  ;;  %v210_v62 = vadd.f32 %v209_v61, %v120_v56  ;;  %v383_v20 = vmul.f32 -1.442695, %v206_v19 }
 0x110   :  { %v211_v63 = vpop.f32.mrf.mxu0 }
 0x111   :  { %v381_v1 = vmul.f32 -1.442695, %v210_v62  ;;  %v212_v21 = vadd.f32 %v211_v63, %v124_v18 }
 0x112   :  { %v215_v2 = vpop.f32.mrf.mxu0 }
 0x113   :  { %458 = vpow2.f32 %v381_v1  ;;  %v216_v3 = vadd.f32 %v215_v2, %v120_v56  ;;  %v384_v23 = vmul.f32 -1.442695, %v212_v21 }
 0x114   :  { %v217_v22 = vpop.f32.mrf.mxu0 }
 0x115   :  { %v382_v4 = vmul.f32 -1.442695, %v216_v3  ;;  %v218_v24 = vadd.f32 %v217_v22, %v124_v18 }
 0x117   :  { %460 = vpow2.f32 %v382_v4  ;;  %v385_v25 = vmul.f32 -1.442695, %v218_v24 }
 0x11c   :  { %v457_v5 = vpop.eup %456 }
 0x11d   :  { %v229_v6 = vadd.f32 1.0, %v457_v5 }
 0x11f   :  { %462 = vrcp.f32 %v229_v6 }
 0x120   :  { %v459_v7 = vpop.eup %458 }
 0x121   :  { %v230_v8 = vadd.f32 1.0, %v459_v7 }
 0x123   :  { %464 = vrcp.f32 %v230_v8 }
 0x124   :  { %v461_v9 = vpop.eup %460 }
 0x125   :  { %v231_v10 = vadd.f32 1.0, %v461_v9 }
 0x127   :  { %466 = vrcp.f32 %v231_v10 }
 0x128   :  { %468 = vpow2.f32 %v383_v20 }
 0x129   :  { %470 = vpow2.f32 %v384_v23 }
 0x12a   :  { %472 = vpow2.f32 %v385_v25 }
 0x12c   :  { %v463_v11 = vpop.eup %462 }
 0x12d   :  { %v256_v12 = vmul.f32 %v463_v11, %v634_v33 }
 0x12f   :  { %438 = vmatmul.mubr.f32.vlgmr.msra.gmra.mxu1 %v256_v12 }
 0x130   :  { %v465_v13 = vpop.eup %464  ;;  %440 = vmatprep.mubr.msk.f32.mxu1 %vm580_vm0, %v579_v0 }
 0x131   :  { %v257_v14 = vmul.f32 %v465_v13, %v638_v34 }
 0x133   :  { %441 = vmatmul.mubr.f32.gmra.mxu1 %v257_v14 }
 0x134   :  { %v467_v15 = vpop.eup %466  ;;  %443 = vmatprep.mubr.msk.f32.mxu1 %vm580_vm0, %v579_v0 }
 0x135   :  { %v258_v16 = vmul.f32 %v467_v15, %v642_v35  ;;  %v469_v26 = vpop.eup %468 }
 0x136   :  { %v247_v27 = vadd.f32 1.0, %v469_v26  ;;  %v471_v28 = vpop.eup %470 }
 0x137   :  { %444 = vmatmul.mubr.f32.gmra.mxu1 %v258_v16  ;;  %v248_v0 = vadd.f32 1.0, %v471_v28  ;;  %v473_v29 = vpop.eup %472 }
 0x138   :  { %474 = vrcp.f32 %v247_v27  ;;  %v249_v32 = vadd.f32 1.0, %v473_v29 }
 0x139   :  { %476 = vrcp.f32 %v248_v0 }
 0x145   :  { %v475_v43 = vpop.eup %474 }
 0x146   :  { %v342_v45 = vsub.f32 1.0, %v475_v43  ;;  %v477_v46 = vpop.eup %476 }
 0x147   :  { %v343_v50 = vsub.f32 1.0, %v477_v46 }
 0x148   :  { %v346_v49 = vmul.f32 %v345_v47, %v342_v45 }
 0x149   :  { %v347_v55 = vmul.f32 %v345_v47, %v343_v50 }
 0x1ef   :  { %v325_v31 = vpop.f32.mrf.mxu1 }
 0x1f0   :  { %v326_v36 = vadd.f32 %v379_v30, %v325_v31 }
 0x1f1   :  { %v439_v37 = vpop.f32.mrf.mxu1 }
 0x1f2   :  { %478 = vtanh.f32 %v326_v36 }
 0x1f3   :  { %v330_v38 = vpop.f32.mrf.mxu1  ;;  %480 = vrcp.f32 %v249_v32 }
 0x1f4   :  { %v331_v39 = vadd.f32 %v379_v30, %v330_v38 }
 0x1f5   :  { %v442_v40 = vpop.f32.mrf.mxu1 }
 0x1f6   :  { %482 = vtanh.f32 %v331_v39 }
 0x1f7   :  { %v335_v41 = vpop.f32.mrf.mxu1 }
 0x1f8   :  { %v336_v42 = vadd.f32 %v379_v30, %v335_v41 }
 0x1f9   :  { %v445_v44 = vpop.f32.mrf.mxu1 }
 0x1fa   :  { %484 = vtanh.f32 %v336_v42 }
 0x1ff   :  { %v479_v48 = vpop.eup %478 }
 0x200   :  { %v349_v51 = vsub.f32 %v479_v48, %v634_v33  ;;  %v481_v52 = vpop.eup %480 }
 0x201   :  { %v344_v56 = vsub.f32 1.0, %v481_v52 }
 0x202   :  { %v352_v53 = vmul.f32 %v349_v51, %v346_v49 }
 0x203   :  { %v483_v54 = vpop.eup %482  ;;  %v348_v61 = vmul.f32 %v345_v47, %v344_v56 }
 0x204   :  { %v350_v57 = vsub.f32 %v483_v54, %v638_v34  ;;  %v355_v58 = vadd.f32 %v352_v53, %v634_v33 }
 0x206   :  { %v353_v59 = vmul.f32 %v350_v57, %v347_v55  ;;  %358 = vst [vmem:[#allocation9] sm:$0xff] %v355_v58 }
 0x207   :  { %v485_v60 = vpop.eup %484 }
 0x208   :  { %v351_v62 = vsub.f32 %v485_v60, %v642_v35  ;;  %v356_v63 = vadd.f32 %v353_v59, %v638_v34 }
 0x20a   :  { %v354_v1 = vmul.f32 %v351_v62, %v348_v61  ;;  %359 = vst [vmem:[#allocation9 + $0x8] sm:$0xff] %v356_v63 }
 0x20c   :  { %v357_v2 = vadd.f32 %v354_v1, %v642_v35 }
 0x20e   :  { %360 = vst [vmem:[#allocation9 + $0x10] sm:$0xff] %v357_v2 }
 0x20f   :  { %557 = shalt.err (!%p554_p5)
}
 0x210   :  { %372 = dma.vmem_to_hbm [thread:$0]  %s367_s17, 384, %s696_s6, [#allocation5], %s576_s7, %s576_s7, %s577_s8  }
 0x211   :  { %570 = dma.done.wait [#allocation5], 384  }
 0x212   :  { %571 = vsyncadd [#allocation5], 4294966912 }
 0x213   :  { %376 = vsyncpa [#allocation4], 1 }
 0x214   :  { %377 = vsyncpa [#allocation7], 1 }
 0x215   :  { %378 = vsyncpa [#allocation5], 1 }

</bundles_post_ra>
